<compile_context>
chip_gen: v7x
topology: tpu7x:2x2x1
jax: 0.10.0
libtpu: 0.0.40
codegen_flags: <defaults>
</compile_context>

<pallas_src>
import jax
import jax.numpy as jnp
from jax.experimental import pallas as pl
from jax.experimental.pallas import tpu as pltpu

LANES = 128
ROW_ALIGN = 16  # covers f32 (8,128) and bf16/f16 (16,128) minimum tiles


def _device_tuning():
    """Per-generation knobs picked from the local device kind (trace time)."""
    kind = ""
    try:
        kind = jax.devices()[0].device_kind.lower()
    except Exception:
        pass
    is_v7 = "v7" in kind
    # v7x has 2 TensorCores per chip -> shard the streaming reduction across
    # them; v5e/v6e (single TC) keep one shard (bigger tiles, smaller tails).
    num_shards = 2 if is_v7 else 1
    # ~1 MiB per input tile on v5e/v6e (measured ~85% of HBM roofline there),
    # ~2 MiB on v7x to amortize the ~0.35us/step overhead against faster HBM.
    tile_bytes = (2 << 20) if is_v7 else (1 << 20)
    vmem_limit = (48 << 20) if is_v7 else (32 << 20)
    return num_shards, tile_bytes, vmem_limit


def _plan(rows, num_shards, max_tile_rows):
    """Balanced tiling: minimize step count first, then even out the tile."""
    per_shard = pl.cdiv(rows, num_shards)
    steps = pl.cdiv(per_shard, max_tile_rows)
    row_tile = ROW_ALIGN * pl.cdiv(per_shard, ROW_ALIGN * steps)
    # A block must never be taller than the array itself (edge blocks may be
    # partial, but block_shape has to fit); rows >= ROW_ALIGN is guaranteed.
    row_tile = min(row_tile, ROW_ALIGN * (rows // ROW_ALIGN))
    steps = pl.cdiv(per_shard, row_tile)
    return steps, row_tile


def _make_partial_sums_kernel(rows_valid, steps, row_tile, need_mask):
    """Per-shard streaming partial sums of diff^2 and |diff| (plan baked in)."""

    def kernel(p_ref, t_ref, ssq_ref, sabs_ref):
        step = pl.program_id(1)

        @pl.when(step == 0)
        def _init():
            ssq_ref[...] = jnp.zeros_like(ssq_ref)
            sabs_ref[...] = jnp.zeros_like(sabs_ref)

        diff = p_ref[...].astype(jnp.float32) - t_ref[...].astype(jnp.float32)
        a = jnp.abs(diff)

        if need_mask:
            # Rows at/after `rows_valid` belong to a partial edge block whose
            # DMA'd contents are undefined: zero them before BOTH sums.
            shard = pl.program_id(0)
            row0 = (shard * steps + step) * row_tile
            row_ids = jax.lax.broadcasted_iota(jnp.int32, (row_tile, LANES), 0)
            a = jnp.where(row_ids < (rows_valid - row0), a, 0.0)

        # (row_tile,128) -> (row_tile//8, 8, 128): whole-vreg reshape; the
        # axis-0 reduction is pure VPU adds (cross-lane collapse happens once,
        # in the wrapper epilogue).
        a3 = a.reshape(-1, 8, LANES)
        sabs_ref[...] += jnp.sum(a3, axis=0, keepdims=True)
        # |d|*|d| == d*d bit-exactly, so one masked temp feeds both sums.
        ssq_ref[...] += jnp.sum(a3 * a3, axis=0, keepdims=True)

    return kernel


def lai_loss(y_pred, y_true, alpha=1.0):
    assert y_pred.shape == y_true.shape
    n_elems = int(y_pred.size)
    assert n_elems > 0

    # Keep narrow dtypes narrow on the wire; upcast to f32 only in-register.
    supported = (jnp.dtype(jnp.float32), jnp.dtype(jnp.bfloat16), jnp.dtype(jnp.float16))
    if jnp.dtype(y_pred.dtype) not in supported:
        y_pred = y_pred.astype(jnp.float32)
    if jnp.dtype(y_true.dtype) != jnp.dtype(y_pred.dtype):
        y_true = y_true.astype(y_pred.dtype)
    itemsize = jnp.dtype(y_pred.dtype).itemsize

    p_flat = y_pred.reshape(-1)
    t_flat = y_true.reshape(-1)

    # ---- Lane alignment (the only case that can materialize a copy) -------
    # rows is at least one minimum tile; element counts that are multiples of
    # 128 (and >= 2048) hit a fully zero-copy reshape.  Zero padding is exact
    # because the divisors below use the true (unpadded) element count.
    rows = max(pl.cdiv(n_elems, LANES), ROW_ALIGN)
    pad = rows * LANES - n_elems
    if pad:
        p_flat = jnp.concatenate([p_flat, jnp.zeros((pad,), p_flat.dtype)])
        t_flat = jnp.concatenate([t_flat, jnp.zeros((pad,), t_flat.dtype)])
    p2d = p_flat.reshape(rows, LANES)
    t2d = t_flat.reshape(rows, LANES)

    # ---- Tiling plan (all static Python ints) ------------------------------
    num_shards, tile_bytes, vmem_limit = _device_tuning()
    max_tile_rows = max(
        ROW_ALIGN, (tile_bytes // (LANES * itemsize)) // ROW_ALIGN * ROW_ALIGN
    )
    steps, row_tile = _plan(rows, num_shards, max_tile_rows)
    # No block may start fully out of bounds; fall back to a single shard for
    # shapes where the 2-way split would create one.
    if num_shards > 1 and (num_shards * steps - 1) * row_tile >= rows:
        num_shards = 1
        steps, row_tile = _plan(rows, num_shards, max_tile_rows)

    covered_rows = num_shards * steps * row_tile
    need_mask = covered_rows > rows
    kernel = _make_partial_sums_kernel(rows, steps, row_tile, need_mask)

    cost = pl.CostEstimate(
        flops=6 * covered_rows * LANES,
        transcendentals=0,
        bytes_accessed=2 * rows * LANES * itemsize + 2 * num_shards * 8 * LANES * 4,
    )

    # ---- Pallas streaming reduction ----------------------------------------
    ssq_p, sabs_p = pl.pallas_call(
        kernel,
        out_shape=(
            jax.ShapeDtypeStruct((num_shards, 8, LANES), jnp.float32),
            jax.ShapeDtypeStruct((num_shards, 8, LANES), jnp.float32),
        ),
        grid_spec=pltpu.PrefetchScalarGridSpec(
            num_scalar_prefetch=0,
            grid=(num_shards, steps),
            in_specs=[
                pl.BlockSpec((row_tile, LANES), lambda s, i: (s * steps + i, 0)),
                pl.BlockSpec((row_tile, LANES), lambda s, i: (s * steps + i, 0)),
            ],
            out_specs=[
                pl.BlockSpec((1, 8, LANES), lambda s, i: (s, 0, 0)),
                pl.BlockSpec((1, 8, LANES), lambda s, i: (s, 0, 0)),
            ],
        ),
        compiler_params=pltpu.CompilerParams(
            # Shard axis across TensorCores on multi-core chips; inner axis is
            # the accumulating (resident-output) reduction.
            # TODO(synk): try pltpu.CORE_PARALLEL for the shard axis on v7x
            # once a profile confirms both TCs stream HBM concurrently.
            dimension_semantics=("parallel", "arbitrary"),
            vmem_limit_bytes=vmem_limit,
        ),
        cost_estimate=cost,
    )(p2d, t2d)

    # ---- Tiny scalar epilogue (one fused XLA op over <=2*8*128 partials) ---
    ssq = jnp.sum(ssq_p)
    sabs = jnp.sum(sabs_p)
    n = jnp.float32(n_elems)
    loss = ssq / n                    # MSE, mean reduction
    k = 2.0 * sabs / (n * n)          # mean(|d loss / d y_pred|)
    k2 = k * k
    denom = 1.0 + k2
    if alpha >= 1:                    # static Python branch, as in the torch code
        lai = jnp.maximum(k2 / denom, jnp.float32(alpha) / denom)
    else:
        lai = jnp.maximum(k2 / (jnp.float32(alpha) * denom), 1.0 / denom)
    return loss * lai


def _lai_loss_ref(y_pred, y_true, alpha=1.0):
    """Pure-JAX reference of the same math, for sanity checks."""
    p = y_pred.astype(jnp.float32)
    t = y_true.astype(jnp.float32)
    n = jnp.float32(p.size)
    diff = p - t
    loss = jnp.mean(diff * diff)
    k = jnp.mean(jnp.abs(2.0 * diff / n))
    k2 = k * k
    denom = 1.0 + k2
    if alpha >= 1:
        lai = jnp.maximum(k2 / denom, alpha / denom)
    else:
        lai = jnp.maximum(k2 / (alpha * denom), 1.0 / denom)
    return loss * lai


if __name__ == "__main__":
    key = jax.random.PRNGKey(0)
    k1, k2, k3, k4, k5, k6 = jax.random.split(key, 6)

    # 1) NCHW inputs: batch=2, channels=4, spatial=16x16 -> 2048 elems
    #    (128-aligned -> zero-copy path, exact single-tile grid).
    y_pred = jax.random.normal(k1, (2, 4, 16, 16), dtype=jnp.float32)
    y_true = jax.random.normal(k2, (2, 4, 16, 16), dtype=jnp.float32)
    out = jax.block_until_ready(lai_loss(y_pred, y_true, alpha=1.0))
    ref = jax.block_until_ready(_lai_loss_ref(y_pred, y_true, alpha=1.0))
    assert jnp.allclose(out, ref, rtol=1e-5, atol=1e-6), (out, ref)

    # 2) Odd size (1530 elems, not 128-aligned) + alpha < 1 branch:
    #    exercises the minimal lane pad and the in-kernel tail masking path.
    y_pred2 = jax.random.normal(k3, (2, 3, 15, 17), dtype=jnp.float32)
    y_true2 = jax.random.normal(k4, (2, 3, 15, 17), dtype=jnp.float32)
    out2 = jax.block_until_ready(lai_loss(y_pred2, y_true2, alpha=0.5))
    ref2 = jax.block_until_ready(_lai_loss_ref(y_pred2, y_true2, alpha=0.5))
    assert jnp.allclose(out2, ref2, rtol=1e-5, atol=1e-6), (out2, ref2)

    # 3) Larger streaming case (4096 rows) to exercise multi-step accumulation.
    y_pred3 = jax.random.normal(k5, (4, 8, 128, 128), dtype=jnp.float32)
    y_true3 = jax.random.normal(k6, (4, 8, 128, 128), dtype=jnp.float32)
    out3 = jax.block_until_ready(lai_loss(y_pred3, y_true3, alpha=2.0))
    ref3 = jax.block_until_ready(_lai_loss_ref(y_pred3, y_true3, alpha=2.0))
    assert jnp.allclose(out3, ref3, rtol=1e-4, atol=1e-6), (out3, ref3)

    print("KERNEL_OK")
</pallas_src>

<mosaic_0001>
module attributes {stable_mosaic.version = 11 : i64} {
  func.func @kernel(%arg0: i32, %arg1: i32, %arg2: memref<16x128xf32, #tpu.memory_space<vmem>>, %arg3: memref<16x128xf32, #tpu.memory_space<vmem>>, %arg4: memref<1x8x128xf32, #tpu.memory_space<vmem>>, %arg5: memref<1x8x128xf32, #tpu.memory_space<vmem>>) attributes {dimension_semantics = [#tpu.dimension_semantics<parallel>, #tpu.dimension_semantics<arbitrary>], iteration_bounds = array<i64: 1, 1>, scalar_prefetch = 0 : i64, scratch_operands = 0 : i64, tpu.core_type = #tpu.core_type<tc>, window_params = [{transform_indices = @transform_0, window_bounds = array<i64: 16, 128>}, {transform_indices = @transform_1, window_bounds = array<i64: 16, 128>}, {transform_indices = @transform_2, window_bounds = array<i64: 1, 8, 128>}, {transform_indices = @transform_3, window_bounds = array<i64: 1, 8, 128>}]} {
    %c0_i32 = arith.constant 0 : i32
    %0 = arith.cmpi eq, %arg1, %c0_i32 : i32
    %1 = arith.extui %0 : i1 to i32
    %c0_i32_0 = arith.constant 0 : i32
    %2 = arith.cmpi ne, %1, %c0_i32_0 : i32
    scf.if %2 {
      %cst_17 = arith.constant 0.000000e+00 : f32
      %19 = vector.broadcast %cst_17 : f32 to vector<1x8x128xf32>
      %c0_18 = arith.constant 0 : index
      %c0_19 = arith.constant 0 : index
      %c0_20 = arith.constant 0 : index
      %20 = vector.load %arg4[%c0_18, %c0_19, %c0_20] : memref<1x8x128xf32, #tpu.memory_space<vmem>>, vector<1x8x128xf32>
      tpu.vector_store %arg4[%c0_18, %c0_19, %c0_20], %19 {strides = array<i32>} : memref<1x8x128xf32, #tpu.memory_space<vmem>>, vector<1x8x128xf32>,
      %cst_21 = arith.constant 0.000000e+00 : f32
      %21 = vector.broadcast %cst_21 : f32 to vector<1x8x128xf32>
      %c0_22 = arith.constant 0 : index
      %c0_23 = arith.constant 0 : index
      %c0_24 = arith.constant 0 : index
      %22 = vector.load %arg5[%c0_22, %c0_23, %c0_24] : memref<1x8x128xf32, #tpu.memory_space<vmem>>, vector<1x8x128xf32>
      tpu.vector_store %arg5[%c0_22, %c0_23, %c0_24], %21 {strides = array<i32>} : memref<1x8x128xf32, #tpu.memory_space<vmem>>, vector<1x8x128xf32>,
    } else {
    }
    %c0 = arith.constant 0 : index
    %c0_1 = arith.constant 0 : index
    %3 = vector.load %arg2[%c0, %c0_1] : memref<16x128xf32, #tpu.memory_space<vmem>>, vector<16x128xf32>
    %c0_2 = arith.constant 0 : index
    %c0_3 = arith.constant 0 : index
    %4 = vector.load %arg3[%c0_2, %c0_3] : memref<16x128xf32, #tpu.memory_space<vmem>>, vector<16x128xf32>
    %5 = arith.subf %3, %4 : vector<16x128xf32>
    %6 = math.absf %5 : vector<16x128xf32>
    %7 = vector.shape_cast %6 : vector<16x128xf32> to vector<2x8x128xf32>
    %c0_4 = arith.constant 0 : index
    %c0_5 = arith.constant 0 : index
    %c0_6 = arith.constant 0 : index
    %8 = vector.load %arg5[%c0_4, %c0_5, %c0_6] : memref<1x8x128xf32, #tpu.memory_space<vmem>>, vector<1x8x128xf32>
    %cst = arith.constant dense<0.000000e+00> : vector<8x128xf32>
    %9 = vector.multi_reduction <add>, %7, %cst [0] : vector<2x8x128xf32> to vector<8x128xf32>
    %10 = vector.shape_cast %9 : vector<8x128xf32> to vector<1x8x128xf32>
    %11 = arith.addf %8, %10 : vector<1x8x128xf32>
    %c0_7 = arith.constant 0 : index
    %c0_8 = arith.constant 0 : index
    %c0_9 = arith.constant 0 : index
    %12 = vector.load %arg5[%c0_7, %c0_8, %c0_9] : memref<1x8x128xf32, #tpu.memory_space<vmem>>, vector<1x8x128xf32>
    tpu.vector_store %arg5[%c0_7, %c0_8, %c0_9], %11 {strides = array<i32>} : memref<1x8x128xf32, #tpu.memory_space<vmem>>, vector<1x8x128xf32>,
    %c0_10 = arith.constant 0 : index
    %c0_11 = arith.constant 0 : index
    %c0_12 = arith.constant 0 : index
    %13 = vector.load %arg4[%c0_10, %c0_11, %c0_12] : memref<1x8x128xf32, #tpu.memory_space<vmem>>, vector<1x8x128xf32>
    %14 = arith.mulf %7, %7 : vector<2x8x128xf32>
    %cst_13 = arith.constant dense<0.000000e+00> : vector<8x128xf32>
    %15 = vector.multi_reduction <add>, %14, %cst_13 [0] : vector<2x8x128xf32> to vector<8x128xf32>
    %16 = vector.shape_cast %15 : vector<8x128xf32> to vector<1x8x128xf32>
    %17 = arith.addf %13, %16 : vector<1x8x128xf32>
    %c0_14 = arith.constant 0 : index
    %c0_15 = arith.constant 0 : index
    %c0_16 = arith.constant 0 : index
    %18 = vector.load %arg4[%c0_14, %c0_15, %c0_16] : memref<1x8x128xf32, #tpu.memory_space<vmem>>, vector<1x8x128xf32>
    tpu.vector_store %arg4[%c0_14, %c0_15, %c0_16], %17 {strides = array<i32>} : memref<1x8x128xf32, #tpu.memory_space<vmem>>, vector<1x8x128xf32>,
    return
  }
  func.func @transform_0(%arg0: i32, %arg1: i32) -> (i32, i32) {
    %c1_i32 = arith.constant 1 : i32
    %0 = arith.muli %arg0, %c1_i32 : i32
    %1 = arith.addi %0, %arg1 : i32
    %c0_i32 = arith.constant 0 : i32
    %c0_i32_0 = arith.constant 0 : i32
    return %1, %c0_i32 : i32, i32
  }
  func.func @transform_1(%arg0: i32, %arg1: i32) -> (i32, i32) {
    %c1_i32 = arith.constant 1 : i32
    %0 = arith.muli %arg0, %c1_i32 : i32
    %1 = arith.addi %0, %arg1 : i32
    %c0_i32 = arith.constant 0 : i32
    %c0_i32_0 = arith.constant 0 : i32
    return %1, %c0_i32 : i32, i32
  }
  func.func @transform_2(%arg0: i32, %arg1: i32) -> (i32, i32, i32) {
    %c0_i32 = arith.constant 0 : i32
    %c0_i32_0 = arith.constant 0 : i32
    %c0_i32_1 = arith.constant 0 : i32
    return %arg0, %c0_i32, %c0_i32_0 : i32, i32, i32
  }
  func.func @transform_3(%arg0: i32, %arg1: i32) -> (i32, i32, i32) {
    %c0_i32 = arith.constant 0 : i32
    %c0_i32_0 = arith.constant 0 : i32
    %c0_i32_1 = arith.constant 0 : i32
    return %arg0, %c0_i32, %c0_i32_0 : i32, i32, i32
  }
}

</mosaic_0001>

<bundles_post_ra>
// kernel: tpu_custom_call.1
= control target key start
LH: loop header
LB: loop body
LE: loop exit
PB: predicated region body
PF: predicated region fallthrough
CT: control target
= control target key end

     0   :  { %9 = vsyncpa [#allocation3], 0  ;;  %s286_s0 = inlined_call_operand.hbm [shape: f32[16,128], index: 0, kind: input, shape index: {}]   ;;  %s287_s1 = inlined_call_operand.hbm [shape: f32[16,128], index: 1, kind: input, shape index: {}]   ;;  %s288_s2 = inlined_call_operand.hbm [shape: f32[1,8,128], index: 2, kind: output, shape index: {0}]   ;;  %s289_s3 = inlined_call_operand.hbm [shape: f32[1,8,128], index: 3, kind: output, shape index: {1}]  }
   0x1   :  { %10 = vsyncpa [#allocation6], 0 }
   0x2   :  { %11 = vsyncpa [#allocation4], 0 }
   0x3   :  { %12 = vsyncpa [#allocation9], 0  ;;  %s212_s12 = smov [#allocation2]   ;;  %s116_s16 = scalar_lea.hbm %s286_s0, 256 }
   0x4   :  { %s22_s13 = sshll.u32 %s212_s12, 4  ;;  %p117_p0 = scmp.ne.s32.totalorder %s286_s0, %s116_s16  ;;  %s23_s13 = int_to_ptr.vmem [resolvable:$true] %s22_s13 }
   0x5   :  { %p120_p1 = scmp.lt.u32.totalorder %s116_s16, %s286_s0 }
   0x7   :  { %p122_p2 = pnand %p120_p1, %p117_p0 }
   0x9   :  { %125 = shalt.err (!%p122_p2)
}
   0xa   :  { %s126_s21 = scalar_lea.vmem %s23_s13, 256  ;;  %p131_p4 = scmp.lt.s32.totalorder %s23_s13, %s23_s13 }
   0xb   :  { %p127_p3 = scmp.ne.s32.totalorder %s23_s13, %s126_s21  ;;  %p132_p5 = scmp.lt.s32.totalorder %s126_s21, %s126_s21 }
   0xd   :  { %p133_p6 = por %p132_p5, %p131_p4 }
   0xf   :  { %p134_p7 = pnand %p133_p6, %p127_p3 }
  0x11   :  { %137 = shalt.err (!%p134_p7)
}
  0x12   :  { %s213_s22 = smov 128   ;;  %s214_s23 = smov 8  }
  0x13   :  { %28 = dma.hbm_to_vmem [thread:$0]  %s286_s0, 256, %s23_s13, [#allocation3], %s213_s22, %s213_s22, %s214_s23  }
  0x14   :  { %s215_s26 = smov [#allocation5]   ;;  %s138_s30 = scalar_lea.hbm %s287_s1, 256 }
  0x15   :  { %s38_s27 = sshll.u32 %s215_s26, 4  ;;  %p139_p8 = scmp.ne.s32.totalorder %s287_s1, %s138_s30  ;;  %s39_s27 = int_to_ptr.vmem [resolvable:$true] %s38_s27 }
  0x16   :  { %p142_p9 = scmp.lt.u32.totalorder %s138_s30, %s287_s1 }
  0x18   :  { %p144_p10 = pnand %p142_p9, %p139_p8 }
  0x1a   :  { %147 = shalt.err (!%p144_p10)
}
  0x1b   :  { %s148_s8 = scalar_lea.vmem %s39_s27, 256  ;;  %p153_p12 = scmp.lt.s32.totalorder %s39_s27, %s39_s27 }
  0x1c   :  { %p149_p11 = scmp.ne.s32.totalorder %s39_s27, %s148_s8  ;;  %p154_p13 = scmp.lt.s32.totalorder %s148_s8, %s148_s8 }
  0x1e   :  { %p155_p0 = por %p154_p13, %p153_p12 }
  0x20   :  { %p156_p1 = pnand %p155_p0, %p149_p11 }
  0x22   :  { %159 = shalt.err (!%p156_p1)
}
  0x23   :  { %44 = dma.hbm_to_vmem [thread:$0]  %s287_s1, 256, %s39_s27, [#allocation6], %s213_s22, %s213_s22, %s214_s23  }
  0x24   :  { %204 = dma.done.wait [#allocation3], 256  }
  0x25   :  { %205 = vsyncadd [#allocation3], 4294967040 }
  0x26   :  { %206 = dma.done.wait [#allocation6], 256  }
  0x27   :  { %207 = vsyncadd [#allocation6], 4294967040  ;;  %v61_v0 = vld [vmem:[#allocation2] sm:$0xff]  ;;  %v62_v1 = vld [vmem:[#allocation2 + $0x8] sm:$0xff]  ;;  %s216_s10 = smov [#allocation8]   ;;  %s217_s12 = smov [#allocation7]  }
  0x28   :  { %v63_v2 = vld [vmem:[#allocation5] sm:$0xff]  ;;  %v64_v3 = vld [vmem:[#allocation5 + $0x8] sm:$0xff]  ;;  %s95_s11 = sshll.u32 %s216_s10, 4  ;;  %s85_s13 = sshll.u32 %s217_s12, 4  ;;  %s96_s11 = int_to_ptr.vmem [resolvable:$true] %s95_s11  ;;  %s86_s13 = int_to_ptr.vmem [resolvable:$true] %s85_s13 }
  0x29   :  { %v65_v4 = vsub.f32 %v61_v0, %v63_v2  ;;  %v66_v5 = vsub.f32 %v62_v1, %v64_v3  ;;  %s160_s1 = scalar_lea.vmem %s96_s11, 128  ;;  %p165_p3 = scmp.lt.s32.totalorder %s96_s11, %s96_s11 }
  0x2a   :  { %p161_p2 = scmp.ne.s32.totalorder %s96_s11, %s160_s1  ;;  %p166_p4 = scmp.lt.s32.totalorder %s160_s1, %s160_s1 }
  0x2b   :  { %v67_v6 = vand.u32 2147483647, %v65_v4  ;;  %v68_v7 = vand.u32 2147483647, %v66_v5 }
  0x2c   :  { %p167_p5 = por %p166_p4, %p165_p3 }
  0x2d   :  { %v74_v8 = vmul.f32 %v67_v6, %v67_v6  ;;  %v70_v9 = vadd.f32 %v68_v7, %v67_v6  ;;  %v75_v10 = vmul.f32 %v68_v7, %v68_v7 }
  0x2e   :  { %p168_p6 = pnand %p167_p5, %p161_p2 }
  0x2f   :  { %v76_v11 = vadd.f32 %v75_v10, %v74_v8  ;;  %72 = vst [vmem:[#allocation8] sm:$0xff] %v70_v9 }
  0x30   :  { %171 = shalt.err (!%p168_p6)
}
  0x31   :  { %s172_s16 = scalar_lea.hbm %s289_s3, 128 }
  0x32   :  { %p173_p7 = scmp.ne.s32.totalorder %s289_s3, %s172_s16  ;;  %p176_p8 = scmp.lt.u32.totalorder %s172_s16, %s289_s3 }
  0x34   :  { %p178_p9 = pnand %p176_p8, %p173_p7 }
  0x36   :  { %181 = shalt.err (!%p178_p9)
}
  0x37   :  { %98 = dma.vmem_to_hbm [thread:$0]  %s96_s11, 128, %s289_s3, [#allocation9]   ;;  %78 = vst [vmem:[#allocation7] sm:$0xff] %v76_v11 }
  0x38   :  { %s182_s23 = scalar_lea.vmem %s86_s13, 128  ;;  %p187_p11 = scmp.lt.s32.totalorder %s86_s13, %s86_s13 }
  0x39   :  { %p183_p10 = scmp.ne.s32.totalorder %s86_s13, %s182_s23  ;;  %p188_p12 = scmp.lt.s32.totalorder %s182_s23, %s182_s23 }
  0x3b   :  { %p189_p13 = por %p188_p12, %p187_p11 }
  0x3d   :  { %p190_p0 = pnand %p189_p13, %p183_p10 }
  0x3f   :  { %193 = shalt.err (!%p190_p0)
}
  0x40   :  { %s194_s26 = scalar_lea.hbm %s288_s2, 128 }
  0x41   :  { %p195_p1 = scmp.ne.s32.totalorder %s288_s2, %s194_s26  ;;  %p198_p2 = scmp.lt.u32.totalorder %s194_s26, %s288_s2 }
  0x43   :  { %p200_p3 = pnand %p198_p2, %p195_p1 }
  0x45   :  { %203 = shalt.err (!%p200_p3)
}
  0x46   :  { %88 = dma.vmem_to_hbm [thread:$0]  %s86_s13, 128, %s288_s2, [#allocation4]  }
  0x47   :  { %208 = dma.done.wait [#allocation4], 128  }
  0x48   :  { %209 = vsyncadd [#allocation4], 4294967168 }
  0x49   :  { %210 = dma.done.wait [#allocation9], 128  }
  0x4a   :  { %211 = vsyncadd [#allocation9], 4294967168 }
  0x4b   :  { %105 = vsyncpa [#allocation3], 1 }
  0x4c   :  { %106 = vsyncpa [#allocation6], 1 }
  0x4d   :  { %107 = vsyncpa [#allocation4], 1 }
  0x4e   :  { %108 = vsyncpa [#allocation9], 1 }

</bundles_post_ra>
